<compile_context>
chip_gen: v7x
topology: tpu7x:2x2x1
jax: 0.10.0
libtpu: 0.0.40
codegen_flags: <defaults>
</compile_context>

<pallas_src>
import jax
import jax.numpy as jnp
from jax.experimental import pallas as pl
from jax.experimental.pallas import tpu as pltpu


def _round_up(x, m):
    return ((x + m - 1) // m) * m


def _cdiv(a, b):
    return -(-a // b)


def _vmem_capacity_bytes():
    try:
        cap = int(pltpu.get_tpu_info().vmem_capacity_bytes)
        if cap > 0:
            return cap
    except Exception:
        pass
    return 64 * 1024 * 1024  # conservative fallback (v7x physical per-TC)


def _make_classify_kernel(hw_steps, chunks_per_step, nfull_last, rem_last, small_acc):
    """Kernel closure over static tiling parameters.

    Refs: x_ref (n_tile, c1, hw_tile), w_ref (c1, c2_pad) [pre-transposed, 1/HW folded],
          o_ref (1, n_tile, c2_pad), wide_ref (n_tile, c1, 128) f32 scratch.
    """

    def accum(x_ref, wide_ref, nfull):
        # VPU-only accumulation of full 128-lane chunks (no XLU, hidden under DMA).
        if nfull == 0:
            return
        if small_acc:
            acc = wide_ref[...]
            for k in range(nfull):
                acc = acc + x_ref[:, :, k * 128:(k + 1) * 128].astype(jnp.float32)
            wide_ref[...] = acc
        else:
            for k in range(nfull):
                wide_ref[...] += x_ref[:, :, k * 128:(k + 1) * 128].astype(jnp.float32)

    def kernel(x_ref, w_ref, o_ref, wide_ref):
        j = pl.program_id(1)

        @pl.when(j == 0)
        def _():
            wide_ref[...] = jnp.zeros_like(wide_ref)

        if hw_steps == 1:
            accum(x_ref, wide_ref, nfull_last)
        else:
            @pl.when(j < hw_steps - 1)
            def _():
                accum(x_ref, wide_ref, chunks_per_step)

            @pl.when(j == hw_steps - 1)
            def _():
                accum(x_ref, wide_ref, nfull_last)

        @pl.when(j == hw_steps - 1)
        def _():
            # Single cross-lane reduce per batch block (XLU), then MXU matmul.
            pooled = jnp.sum(wide_ref[...], axis=-1)  # (n_tile, c1) f32
            if rem_last:
                tail = x_ref[:, :, pl.ds(nfull_last * 128, rem_last)].astype(jnp.float32)
                pooled = pooled + jnp.sum(tail, axis=-1)
            o_ref[0] = jnp.dot(
                pooled, w_ref[...], preferred_element_type=jnp.float32
            ).astype(o_ref.dtype)

    return kernel


def classify_forward(x_nchw, weight, *, max_chunks_per_step=32):
    """Classify head: AdaptiveAvgPool2d(1) + Conv2d(c1, c2, 1, bias=False) + flatten.

    x_nchw: (N, C1, H, W) float32 or bfloat16; weight: (C2, C1, 1, 1).
    Returns (N, C2) in x's dtype.
    """
    n, c1, h, w = x_nchw.shape
    c2 = weight.shape[0]
    hw = h * w

    # --- wrapper-side layout plumbing (one-time, tiny) ---
    x_flat = x_nchw.reshape(n, c1, hw)            # contiguous reshape, no copy
    elt = jnp.dtype(x_flat.dtype).itemsize
    w2d = weight.reshape(c2, c1).T.astype(jnp.float32) * (1.0 / float(hw))
    c2_pad = _round_up(c2, 128)
    if c2_pad != c2:
        w2d = jnp.pad(w2d, ((0, 0), (0, c2_pad - c2)))

    # --- generation-aware VMEM budget ---
    vmem_cap = _vmem_capacity_bytes()
    usable = int(vmem_cap * 0.7)                   # headroom for Mosaic internals
    sub = 8 * max(1, 4 // elt)                     # sublane multiple for x's dtype
    c1_lay = _round_up(c1, sub)                    # x buffer sublane padding
    c1_lay32 = _round_up(c1, 8)                    # f32 weight/scratch sublane padding
    w_bytes = c1_lay32 * c2_pad * 4                # weight buffer (pipeline double-buffers it)

    # Rough per-buffer budget for x (before n_tile is known).
    x_budget0 = max(c1_lay * 128 * elt, (usable - 2 * w_bytes - (2 << 20)) // 2)

    # --- batch tiling: exact divisor of n (no batch pad), fits one 128-lane chunk,
    #     >= 2 batch blocks whenever n >= 2 (v7x megacore). ---
    cap_nt = max(1, x_budget0 // (c1_lay * 128 * elt))
    divisors = [d for d in range(1, min(n, cap_nt) + 1) if n % d == 0] or [1]
    n_tile = max(divisors)
    if n >= 2 and n // n_tile < 2:
        two_block = [d for d in divisors if n // d >= 2]
        if two_block:
            n_tile = max(two_block)
    n_blocks = n // n_tile

    # --- spatial tiling: 128-lane chunks, no padding of x anywhere ---
    wide_bytes = n_tile * c1_lay32 * 128 * 4
    out_bytes = _round_up(n_tile, 8) * c2_pad * 4
    fixed = 2 * w_bytes + wide_bytes + 2 * out_bytes + (1 << 20)
    x_budget = max(n_tile * c1_lay * 128 * elt, (usable - fixed) // 2)

    chunks_total = _cdiv(hw, 128)
    chunks_budget = max(1, x_budget // (n_tile * c1_lay * 128 * elt))
    chunks_per_step = int(min(chunks_total, chunks_budget, max_chunks_per_step))
    hw_steps = _cdiv(chunks_total, chunks_per_step)
    if hw_steps == 1:
        hw_tile = hw                        # full extent: no 128 rule, no OOB, no pad
    else:
        hw_tile = chunks_per_step * 128     # multiple of 128; last block is ragged
    last_extent = hw - (hw_steps - 1) * hw_tile
    nfull_last = last_extent // 128
    rem_last = last_extent - nfull_last * 128

    # Explicit VMEM limit covering the real footprint (v5e scoped default is only 16 MiB).
    x_buf_bytes = n_tile * c1_lay * _round_up(hw_tile, 128) * elt
    total_vmem = 2 * x_buf_bytes + fixed
    vmem_limit = int(min(int(vmem_cap * 0.9), max(total_vmem + (4 << 20), 32 << 20)))

    out_dtype = x_flat.dtype
    kernel = _make_classify_kernel(
        hw_steps, chunks_per_step, nfull_last, rem_last,
        small_acc=(n_tile * c1 <= 256),
    )

    cost = pl.CostEstimate(
        flops=2 * n * c1 * c2_pad + n * c1 * hw,
        transcendentals=0,
        bytes_accessed=n * c1 * hw * elt + c1 * c2_pad * 4
        + n * c2_pad * jnp.dtype(out_dtype).itemsize,
    )

    out = pl.pallas_call(
        kernel,
        out_shape=jax.ShapeDtypeStruct((n_blocks, n_tile, c2_pad), out_dtype),
        grid_spec=pltpu.PrefetchScalarGridSpec(
            num_scalar_prefetch=0,
            grid=(n_blocks, hw_steps),
            in_specs=[
                pl.BlockSpec((n_tile, c1, hw_tile), lambda i, j: (i, 0, j)),
                pl.BlockSpec((c1, c2_pad), lambda i, j: (0, 0)),
            ],
            out_specs=pl.BlockSpec((1, n_tile, c2_pad), lambda i, j: (i, 0, 0)),
            scratch_shapes=[pltpu.VMEM((n_tile, c1, 128), jnp.float32)],
        ),
        compiler_params=pltpu.CompilerParams(
            dimension_semantics=("parallel", "arbitrary"),
            vmem_limit_bytes=vmem_limit,
        ),
        cost_estimate=cost,
    )(x_flat, w2d)

    return out.reshape(n * n_tile // n_tile * n_blocks // n_blocks * n_blocks * n_tile // (n_blocks * n_tile) * n, c2_pad)[:, :c2] if False else out.reshape(n, c2_pad)[:, :c2]


if __name__ == "__main__":
    key = jax.random.PRNGKey(0)
    kx, kw, kx2 = jax.random.split(key, 3)

    N, C1, H, W = 2, 4, 16, 16
    C2 = 8

    x = jax.random.normal(kx, (N, C1, H, W), dtype=jnp.float32)
    # Deterministic Conv2d weight (kaiming-uniform-like bound), shape (C2, C1, 1, 1).
    fan_in = C1 * 1 * 1
    bound = (1.0 / fan_in) ** 0.5
    weight = jax.random.uniform(
        kw, (C2, C1, 1, 1), dtype=jnp.float32, minval=-bound, maxval=bound
    )

    def ref_fn(xx):
        pooled = jnp.mean(xx.astype(jnp.float32), axis=(2, 3))          # (N, C1)
        return pooled @ weight.reshape(C2, C1).T.astype(jnp.float32)     # (N, C2)

    # 1) Common case: single HW step, zero padding/copies of x, 2 batch blocks
    #    (megacore-shardable on v7x).
    out = jax.block_until_ready(classify_forward(x, weight))
    assert out.shape == (N, C2)
    assert jnp.allclose(out, ref_fn(x), atol=1e-5, rtol=1e-5)

    # 2) Non-128-multiple HW (tail path) and forced multi-step HW tiling with a ragged
    #    last block (exercises the init / accumulate / finalize phases).
    x2 = jax.random.normal(kx2, (N, C1, 15, 15), dtype=jnp.float32)
    out2a = jax.block_until_ready(classify_forward(x2, weight))
    out2b = jax.block_until_ready(classify_forward(x2, weight, max_chunks_per_step=1))
    assert jnp.allclose(out2a, ref_fn(x2), atol=1e-5, rtol=1e-5)
    assert jnp.allclose(out2b, ref_fn(x2), atol=1e-5, rtol=1e-5)

    # 3) bf16 activations (halves the dominant HBM read; kernel accumulates in f32).
    x_bf16 = x.astype(jnp.bfloat16)
    out_bf16 = jax.block_until_ready(classify_forward(x_bf16, weight))
    assert out_bf16.dtype == jnp.bfloat16
    assert jnp.allclose(out_bf16.astype(jnp.float32), ref_fn(x_bf16), atol=1e-2, rtol=2e-2)

    print("KERNEL_OK")
</pallas_src>

<mosaic_0001>
module attributes {stable_mosaic.version = 11 : i64} {
  func.func @kernel(%arg0: i32, %arg1: i32, %arg2: memref<1x4x256xf32, #tpu.memory_space<vmem>>, %arg3: memref<4x128xf32, #tpu.memory_space<vmem>>, %arg4: memref<1x1x128xf32, #tpu.memory_space<vmem>>, %arg5: memref<1x4x128xf32, #tpu.memory_space<vmem>>) attributes {dimension_semantics = [#tpu.dimension_semantics<parallel>, #tpu.dimension_semantics<arbitrary>], iteration_bounds = array<i64: 2, 1>, scalar_prefetch = 0 : i64, scratch_operands = 1 : i64, tpu.core_type = #tpu.core_type<tc>, window_params = [{transform_indices = @transform_0, window_bounds = array<i64: 1, 4, 256>}, {pipeline_mode = #tpu.pipeline_mode<synchronous>, transform_indices = @transform_1, window_bounds = array<i64: 4, 128>}, {transform_indices = @transform_2, window_bounds = array<i64: 1, 1, 128>}]} {
    %c0_i32 = arith.constant 0 : i32
    %0 = arith.cmpi eq, %arg1, %c0_i32 : i32
    %1 = arith.extui %0 : i1 to i32
    %c0_i32_0 = arith.constant 0 : i32
    %2 = arith.cmpi ne, %1, %c0_i32_0 : i32
    scf.if %2 {
      %cst = arith.constant 0.000000e+00 : f32
      %12 = vector.broadcast %cst : f32 to vector<1x4x128xf32>
      %c0_13 = arith.constant 0 : index
      %c0_14 = arith.constant 0 : index
      %c0_15 = arith.constant 0 : index
      %13 = vector.load %arg5[%c0_13, %c0_14, %c0_15] : memref<1x4x128xf32, #tpu.memory_space<vmem>>, vector<1x4x128xf32>
      tpu.vector_store %arg5[%c0_13, %c0_14, %c0_15], %12 {strides = array<i32>} : memref<1x4x128xf32, #tpu.memory_space<vmem>>, vector<1x4x128xf32>,
    } else {
    }
    %c0 = arith.constant 0 : index
    %c0_1 = arith.constant 0 : index
    %c0_2 = arith.constant 0 : index
    %3 = vector.load %arg5[%c0, %c0_1, %c0_2] : memref<1x4x128xf32, #tpu.memory_space<vmem>>, vector<1x4x128xf32>
    %c0_3 = arith.constant 0 : index
    %c0_4 = arith.constant 0 : index
    %c0_5 = arith.constant 0 : index
    %4 = vector.load %arg2[%c0_3, %c0_4, %c0_5] : memref<1x4x256xf32, #tpu.memory_space<vmem>>, vector<1x4x128xf32>
    %5 = arith.addf %3, %4 : vector<1x4x128xf32>
    %c0_6 = arith.constant 0 : index
    %c0_7 = arith.constant 0 : index
    %c128 = arith.constant 128 : index
    %6 = vector.load %arg2[%c0_6, %c0_7, %c128] : memref<1x4x256xf32, #tpu.memory_space<vmem>>, vector<1x4x128xf32>
    %7 = arith.addf %5, %6 : vector<1x4x128xf32>
    %c0_8 = arith.constant 0 : index
    %c0_9 = arith.constant 0 : index
    %c0_10 = arith.constant 0 : index
    %8 = vector.load %arg5[%c0_8, %c0_9, %c0_10] : memref<1x4x128xf32, #tpu.memory_space<vmem>>, vector<1x4x128xf32>
    tpu.vector_store %arg5[%c0_8, %c0_9, %c0_10], %7 {strides = array<i32>} : memref<1x4x128xf32, #tpu.memory_space<vmem>>, vector<1x4x128xf32>,
    %c0_i32_11 = arith.constant 0 : i32
    %9 = arith.cmpi eq, %arg1, %c0_i32_11 : i32
    %10 = arith.extui %9 : i1 to i32
    %c0_i32_12 = arith.constant 0 : i32
    %11 = arith.cmpi ne, %10, %c0_i32_12 : i32
    scf.if %11 {
      %c0_13 = arith.constant 0 : index
      %c0_14 = arith.constant 0 : index
      %c0_15 = arith.constant 0 : index
      %12 = vector.load %arg5[%c0_13, %c0_14, %c0_15] : memref<1x4x128xf32, #tpu.memory_space<vmem>>, vector<1x4x128xf32>
      %cst = arith.constant dense<0.000000e+00> : vector<1x4xf32>
      %13 = vector.multi_reduction <add>, %12, %cst [2] : vector<1x4x128xf32> to vector<1x4xf32>
      %c0_16 = arith.constant 0 : index
      %c0_17 = arith.constant 0 : index
      %14 = vector.load %arg3[%c0_16, %c0_17] : memref<4x128xf32, #tpu.memory_space<vmem>>, vector<4x128xf32>
      %cst_18 = arith.constant dense<0.000000e+00> : vector<1x128xf32>
      %15 = tpu.matmul %13, %14, %cst_18 {dimension_numbers = #tpu.dot_dimension_numbers<[1], [0], [0], [1], [0, 0, 1, 1], [], []>} : vector<1x4xf32>, vector<4x128xf32>, vector<1x128xf32> -> vector<1x128xf32>
      %c0_19 = arith.constant 0 : index
      %c0_20 = arith.constant 0 : index
      %c0_21 = arith.constant 0 : index
      %16 = vector.load %arg4[%c0_19, %c0_20, %c0_21] : memref<1x1x128xf32, #tpu.memory_space<vmem>>, vector<1x1x128xf32>
      %17 = vector.shape_cast %16 : vector<1x1x128xf32> to vector<1x128xf32>
      %18 = vector.shape_cast %15 : vector<1x128xf32> to vector<1x1x128xf32>
      tpu.vector_store %arg4[%c0_19, %c0_20, %c0_21], %18 {strides = array<i32>} : memref<1x1x128xf32, #tpu.memory_space<vmem>>, vector<1x1x128xf32>,
    } else {
    }
    return
  }
  func.func @transform_0(%arg0: i32, %arg1: i32) -> (i32, i32, i32) {
    %c0_i32 = arith.constant 0 : i32
    %c0_i32_0 = arith.constant 0 : i32
    return %arg0, %c0_i32, %arg1 : i32, i32, i32
  }
  func.func @transform_1(%arg0: i32, %arg1: i32) -> (i32, i32) {
    %c0_i32 = arith.constant 0 : i32
    %c0_i32_0 = arith.constant 0 : i32
    %c0_i32_1 = arith.constant 0 : i32
    return %c0_i32, %c0_i32_0 : i32, i32
  }
  func.func @transform_2(%arg0: i32, %arg1: i32) -> (i32, i32, i32) {
    %c0_i32 = arith.constant 0 : i32
    %c0_i32_0 = arith.constant 0 : i32
    %c0_i32_1 = arith.constant 0 : i32
    return %arg0, %c0_i32, %c0_i32_0 : i32, i32, i32
  }
}

</mosaic_0001>

<bundles_post_ra>
// kernel: tpu_custom_call.1
= control target key start
LH: loop header
LB: loop body
LE: loop exit
PB: predicated region body
PF: predicated region fallthrough
CT: control target
= control target key end

     0   :  { %7 = vsyncpa [#allocation4], 0  ;;  %s875_s0 = inlined_call_operand.hbm [shape: f32[2,4,256], index: 0, kind: input, shape index: {}]   ;;  %s876_s1 = inlined_call_operand.hbm [shape: f32[4,128], index: 1, kind: input, shape index: {}]   ;;  %s877_s2 = inlined_call_operand.hbm [shape: f32[2,1,128], index: 2, kind: output, shape index: {}]  }
   0x1   :  { %9 = vsyncpa [#allocation4 + $0x1], 0 }
   0x2   :  { %10 = vsyncpa [#allocation7], 0 }
   0x3   :  { %11 = vsyncpa [#allocation5], 0 }
   0x4   :  { %13 = vsyncpa [#allocation5 + $0x1], 0  ;;  %s658_s9 = smov 0   ;;  %s660_s10 = smov 0  }
   0x5   :  { %s662_s11 = smov 0   ;;  %s664_s12 = smov 0  }
   0x6   :  { %s666_s13 = smov 0   ;;  %s668_s14 = smov 0  }
   0x7 LB: > { %s393_s15 = sadd.s32 4294967295, %s636_s14   ;;  %s394_s16 = sadd.s32 4294967294, %s636_s14   ;;  %s636_s14 = sphi %s668_s14, %s19_s14   ;;  %s632_s13 = sphi %s666_s13, %s902_s13   ;;  %s628_s12 = sphi %s664_s12, %s901_s12   ;;  %s624_s11 = sphi %s662_s11, %s900_s11   ;;  %s620_s10 = sphi %s660_s10, %s899_s10   ;;  %s616_s9 = sphi %s658_s9, %s898_s9  }
   0x8   : > { %p53_p0 = scmp.ne.s32.totalorder %s620_s10, %s616_s9  ;;  %p692_p1 = scmp.eq.s32.totalorder %s393_s15, 0 }
   0x9   : > { %p696_p2 = scmp.eq.s32.totalorder %s393_s15, 1  ;;  %p104_p3 = scmp.eq.s32.totalorder %s394_s16, 1 }
   0xa   : > { %s882_s17 = scalar_select %p692_p1, 1, 0 }
   0xb   : > { %s883_s18 = scalar_select %p696_p2, 1, 0 }
   0xc   : > { %p702_p4 = por %p692_p1, %p53_p0  ;;  %p395_p5 = scmp.ge.s32.totalorder %s636_s14, 1 }
   0xd   : > { %p707_p6 = por %p104_p3, %p53_p0  ;;  %p111_p7 = scmp.lt.s32.totalorder %s636_s14, 3 }
   0xe   : > { %s884_s19 = scalar_select %p702_p4, 1, 0 }
   0xf   : > { %s885_s20 = scalar_select %p707_p6, 1, 0 }
  0x10   : > { %p712_p8 = pnand %p395_p5, %p111_p7  ;;  %s638_s22 = smov [#allocation6]  }
  0x11   : > { %s124_s23 = sshll.u32 %s638_s22, 4  ;;  %s31_s25 = sadd.s32 1, %s632_s13  ;;  %s125_s23 = int_to_ptr.vmem [resolvable:$true] %s124_s23 }
  0x12   : > { %s886_s21 = scalar_select %p712_p8, 1, 0 }
  0x13   : > { %p425_p10 = pneg %p712_p8  ;;  %s40_s26 = sadd.s32 1, %s624_s11 }
  0x14   : > { %p727_p12 = scmp.ge.s32.totalorder %s31_s25, 2  ;;  %s492_s30 = scalar_lea.hbm %s876_s1, 64 }
  0x15   : > { %p721_p11 = pnand %p425_p10, %p692_p1  ;;  %p493_p13 = scmp.ne.s32.totalorder %s876_s1, %s492_s30 }
  0x16   : > { %s888_s27 = scalar_select %p727_p12, 1, 0 }
  0x17   : > { %p494_p0 = pneg %p721_p11  ;;  %p499_p7 = scmp.lt.u32.totalorder %s492_s30, %s876_s1 }
  0x19   : > { %p495_p3 = pnand %p494_p0, %p493_p13 }
  0x1b   : > { %p496_p5 = pneg %p495_p3 }
  0x1d   : > { %p501_p10 = pnand %p499_p7, %p496_p5 }
  0x1f   : > { %504 = shalt.err (!%p501_p10)
}
  0x20   : > { %s505_s7 = scalar_lea.vmem %s125_s23, 64  ;;  %p513_p4 = scmp.lt.s32.totalorder %s125_s23, %s125_s23 }
  0x21   : > { %p506_p9 = scmp.ne.s32.totalorder %s125_s23, %s505_s7  ;;  %p514_p8 = scmp.lt.s32.totalorder %s505_s7, %s505_s7 }
  0x23   : > { %p508_p6 = pnand %p506_p9, %p494_p0  ;;  %p515_p2 = por %p514_p8, %p513_p4 }
  0x25   : > { %p509_p1 = pneg %p508_p6 }
  0x27   : > { %p516_p12 = pnand %p515_p2, %p509_p1 }
  0x29   : > { %519 = shalt.err (!%p516_p12)
}
  0x2a   : > { %428 = dma.hbm_to_vmem [thread:$0]  (!%p721_p11), %s876_s1, 64, %s125_s23, [#allocation7]  }
  0x2b   : > { %p889_p4 = scmp.ne.s32.totalorder %s888_s27, 0  ;;  %p47_p1 = scmp.ne.s32.totalorder %s624_s11, %s620_s10 }
  0x2c   : > { %p48_p2 = scmp.eq.s32.totalorder %s636_s14, 0  ;;  %p438_p6 = scmp.lt.s32.totalorder %s636_s14, 2 }
  0x2d   : > { %s904_s25 = smov (%p889_p4, %s31_s25), 0  ;;  %p890_p12 = scmp.ne.s32.totalorder %s883_s18, 0 }
  0x2e   : > { %s35_s16 = ssub.s32 %s632_s13, %s904_s25  ;;  %p49_p9 = por %p48_p2, %p47_p1 }
  0x2f   : > { %p38_p8 = scmp.eq.s32.totalorder %s35_s16, 0  ;;  %p759_p13 = por %p890_p12, %p47_p1 }
  0x30   : > { %s135_s24 = sand.u32 1, %s624_s11   ;;  %s409_s27 = sshll.u32 %s632_s13, 7 }
  0x31   : > { %s767_s28 = scalar_select %p38_p8, %s624_s11, %s40_s26  }
  0x32   : > { %s398_s23 = sshll.u32 %s135_s24, 3  ;;  %s773_s3 = scalar_lea.hbm %s875_s0, %s409_s27 }
  0x33   : > { %s139_s18 = scalar_lea.vmem [#allocation3], %s398_s23  ;;  %p777_p11 = pnand %p438_p6, %p49_p9 }
  0x34   : > { %s149_s4 = sshll.u32 %s139_s18, 4  ;;  %s136_s26 = scalar_lea.sflag [#allocation4], %s135_s24  ;;  %s775_s4 = int_to_ptr.vmem [resolvable:$true] %s149_s4 }
  0x35   : > { %s520_s6 = scalar_lea.hbm %s773_s3, 128  ;;  %p522_p3 = pneg %p777_p11 }
  0x36   : > { %p521_p0 = scmp.ne.s32.totalorder %s773_s3, %s520_s6  ;;  %s525_s15 = scalar_lea.hbm %s875_s0, 256 }
  0x37   : > { %p526_p10 = scmp.lt.u32.totalorder %s773_s3, %s875_s0  ;;  %p527_p4 = scmp.lt.u32.totalorder %s525_s15, %s520_s6 }
  0x38   : > { %p523_p5 = pnand %p522_p3, %p521_p0  ;;  %p529_p2 = scmp.lt.u32.totalorder %s520_s6, %s773_s3 }
  0x39   : > { %p528_p1 = por %p527_p4, %p526_p10 }
  0x3a   : > { %p524_p7 = pneg %p523_p5 }
  0x3b   : > { %p530_p6 = por %p529_p2, %p528_p1 }
  0x3d   : > { %p531_p8 = pnand %p530_p6, %p524_p7 }
  0x3f   : > { %534 = shalt.err (!%p531_p8)
}
  0x40   : > { %s535_s24 = scalar_lea.vmem %s775_s4, 128  ;;  %s639_s27 = smov [#allocation3]  }
  0x41   : > { %p536_p9 = scmp.ne.s32.totalorder %s775_s4, %s535_s24  ;;  %s540_s29 = sshll.u32 %s639_s27, 4  ;;  %s541_s29 = int_to_ptr.vmem [resolvable:$false] %s540_s29 }
  0x42   : > { %s542_s30 = scalar_lea.vmem %s541_s29, 256  ;;  %p543_p5 = scmp.lt.s32.totalorder %s775_s4, %s541_s29 }
  0x43   : > { %p538_p12 = pnand %p536_p9, %p522_p3  ;;  %p544_p10 = scmp.lt.s32.totalorder %s542_s30, %s535_s24 }
  0x45   : > { %p539_p0 = pneg %p538_p12  ;;  %p545_p4 = por %p544_p10, %p543_p5 }
  0x47   : > { %p546_p1 = pnand %p545_p4, %p539_p0 }
  0x49   : > { %549 = shalt.err (!%p546_p1)
}
  0x4a   : > { %432 = dma.hbm_to_vmem [thread:$0]  (!%p777_p11), %s773_s3, 128, %s775_s4, %s136_s26  }
  0x4b   : > { %p893_p7 = scmp.ne.s32.totalorder %s886_s21, 0 }
  0x4c   : > { %s809_s18 = sand.u32 (!%p893_p7), 1, %s620_s10   ;;  %p894_p3 = scmp.ne.s32.totalorder (!%p893_p7), %s884_s19, 0 }
  0x4d   : > { %158 = sbr.rel (%p893_p7) target bundleno = 480 (0x1e0), region = 28  ;;  %s402_s6 = sshll.u32 (!%p893_p7), %s809_s18, 3 }
  0x4e   : > { %s161_s7 = scalar_lea.sflag (!%p893_p7), [#allocation4], %s809_s18  ;;  %s164_s8 = scalar_lea.vmem (!%p893_p7), [#allocation3], %s402_s6 }
  0x54   : > { %603 = dma.done.wait (%p894_p3), %s161_s7, 128  }
  0x55   : > { %605 = vsyncadd (%p894_p3), %s161_s7, 4294967168  ;;  %p895_p2 = scmp.ne.s32.totalorder %s882_s17, 0 }
  0x57   : > { %607 = dma.done.wait (%p895_p2), [#allocation7], 64  }
  0x58   : > { %609 = vsyncadd (%p895_p2), [#allocation7], 4294967232  ;;  %v640_v0 = vmov 0.0   ;;  %v195_v1 = vld [vmem:[%s164_s8] sm:$0xf]  ;;  %vm204_vm0 = vcmask 1043456   ;;  %v210_v9 = vlaneseq }
  0x59   : > { %193 = vst [vmem:[#allocation2] sm:$0xf] %v640_v0  ;;  %412 = vmatprep.subr.mxu0 %v640_v0  ;;  %v197_v3 = vld [vmem:[%s164_s8 + $0x4] sm:$0xf]  ;;  %v208_v8 = vld [vmem:[#allocation6] sm:$0xf] }
  0x5a   : > { %413 = vmatpush3.msk.msra.mxu0 %vm204_vm0, %v208_v8  ;;  %vm641_vm1 = vmmov 0   ;;  %v211_v10 = vand.u32 127, %v210_v9  ;;  %v213_v11 = vshrl.u32 %v210_v9, 7  ;;  %vm216_vm2 = vcmask 31744   ;;  %s187_s17 = scalar_lea.vmem [#allocation8], %s809_s18  ;;  %s406_s21 = sshll.u32 %s628_s12, 4 }
  0x5b   : > { %414 = vmatprep.mubr.msk.f32.mxu0 %vm641_vm1, %v640_v0  ;;  %s306_s19 = sshll.u32 %s187_s17, 4  ;;  %s828_s5 = scalar_lea.hbm %s877_s2, %s406_s21  ;;  %s823_s19 = int_to_ptr.vmem [resolvable:$true] %s306_s19 }
  0x5c   : > { %v214_v12 = vsub.s32 %v211_v10, %v213_v11  ;;  %s294_s26 = scalar_lea.sflag [#allocation5], %s809_s18  ;;  %s550_s15 = scalar_lea.vmem %s823_s19, 16 }
  0x5d   : > { %p551_p11 = scmp.ne.s32.totalorder %s823_s19, %s550_s15  ;;  %s642_s12 = smov [#allocation8]  }
  0x5e   : > { %s554_s16 = sshll.u32 %s642_s12, 4  ;;  %s555_s16 = int_to_ptr.vmem [resolvable:$false] %s554_s16 }
  0x5f   : > { %p552_p6 = pnand %p551_p11, %p759_p13  ;;  %s556_s23 = scalar_lea.vmem %s555_s16, 32 }
  0x60   : > { %v194_v2 = vld [vmem:[#allocation2] sm:$0xf]  ;;  %p557_p9 = scmp.lt.s32.totalorder %s823_s19, %s555_s16  ;;  %p558_p12 = scmp.lt.s32.totalorder %s556_s23, %s550_s15 }
  0x61   : > { %v196_v4 = vadd.f32 %v195_v1, %v194_v2  ;;  %p553_p8 = pneg %p552_p6 }
  0x62   : > { %p559_p0 = por %p558_p12, %p557_p9 }
  0x63   : > { %v198_v5 = vadd.f32 %v197_v3, %v196_v4 }
  0x64   : > { %p560_p5 = pnand %p559_p0, %p553_p8 }
  0x65   : > { %199 = vst [vmem:[#allocation2] sm:$0xf] %v198_v5 }
  0x6c   : > { %v203_v6 = vld [vmem:[#allocation2] sm:$0xf] }
  0x6d   : > { %v205_v7 = vsel %vm204_vm0, %v203_v6, 0.0 }
  0x6e   : > { %206 = vadd.xlane.f32.xlu0 %v205_v7 }
  0xfb   : > { %v207_v13 = vpop.xlane.xlu0 %206 }
  0xfc   : > { %v215_v14 = vrot.slane %v207_v13, %v214_v12 }
  0xfe   : > { %415 = vmatmul.mubr.msk.f32.vlgmr.msra.gmra.mrb[0].mxu0 %vm216_vm2, %v215_v14 }
 0x1d1   : > { %v288_v15 = vpop.f32.mrb[0].mxu0 }
 0x1d2   : > { %292 = vst [vmem:[%s187_s17] sm:$0x1] %v288_v15  ;;  %v416_v16 = vpop.f32.mrb[1].mxu0 }
 0x1d3   : > { %563 = shalt.err (!%p560_p5)
}
 0x1d4   : > { %s564_s24 = scalar_lea.hbm %s828_s5, 16  ;;  %s568_s30 = scalar_lea.hbm %s877_s2, 32 }
 0x1d5   : > { %p565_p10 = scmp.ne.s32.totalorder %s828_s5, %s564_s24  ;;  %p569_p7 = scmp.lt.u32.totalorder %s828_s5, %s877_s2 }
 0x1d6   : > { %p570_p3 = scmp.lt.u32.totalorder %s568_s30, %s564_s24  ;;  %p572_p11 = scmp.lt.u32.totalorder %s564_s24, %s828_s5 }
 0x1d7   : > { %p566_p4 = pnand %p565_p10, %p759_p13 }
 0x1d8   : > { %p571_p2 = por %p570_p3, %p569_p7 }
 0x1d9   : > { %p567_p1 = pneg %p566_p4 }
 0x1da   : > { %p573_p6 = por %p572_p11, %p571_p2 }
 0x1dc   : > { %p574_p8 = pnand %p573_p6, %p567_p1 }
 0x1de   : > { %577 = shalt.err (!%p574_p8)
}
 0x1df   : > { %423 = dma.vmem_to_hbm [thread:$0]  (%p759_p13), %s823_s19, 16, %s828_s5, %s294_s26  }
 0x1e0 PF: > { %s318_s7 = sand.u32 1, %s616_s9   ;;  %p896_p9 = scmp.ne.s32.totalorder %s885_s20, 0 }
 0x1e1   : > { %p897_p12 = scmp.ge.s32.totalorder %s636_s14, 2  ;;  %s319_s8 = scalar_lea.sflag [#allocation5], %s318_s7 }
 0x1e3   : > { %p434_p0 = pnand %p897_p12, %p896_p9 }
 0x1e5   : > { %611 = dma.done.wait (!%p434_p0), %s319_s8, 16  }
 0x1e6   : > { %613 = vsyncadd (!%p434_p0), %s319_s8, 4294967280  ;;  %s19_s14 = sadd.s32 1, %s636_s14   ;;  %s898_s9 = smov %s620_s10 }
 0x1e7   : > { %p16_p5 = scmp.ge.s32.totalorder %s19_s14, 4   ;;  %s899_s10 = smov %s624_s11 }
 0x1e8   : > { %s900_s11 = smov %s767_s28  ;;  %s901_s12 = smov %s632_s13 }
 0x1e9   : > { %s902_s13 = smov %s904_s25  ;;  %18 = sbr.rel (!%p16_p5) target bundleno = 7 (0x7), region = 85 }
 0x1f0   :  { %323 = vsyncpa [#allocation4], 1 }
 0x1f1   :  { %325 = vsyncpa [#allocation4 + $0x1], 1 }
 0x1f2   :  { %326 = vsyncpa [#allocation7], 1 }
 0x1f3   :  { %327 = vsyncpa [#allocation5], 1 }
 0x1f4   :  { %329 = vsyncpa [#allocation5 + $0x1], 1 }

</bundles_post_ra>
